<compile_context>
chip_gen: v5e
topology: v5e:2x2
jax: 0.10.0
libtpu: 0.0.40
codegen_flags: <defaults>
</compile_context>

<pallas_src>
import functools

import jax
import jax.numpy as jnp
from jax import lax
from jax.experimental import pallas as pl
from jax.experimental.pallas import tpu as pltpu


def _sigmoid(v):
    # exact logistic; exp lowers to the EUP, the remaining divide is negligible.
    return 1.0 / (1.0 + jnp.exp(-v))


def _cbam_kernel(x_ref, w1_ref, w2_ref, amax_ref, aavg_ref, o_ref,
                 sm_ref, sa_ref, *, bt):
    """Fused CBAM forward for one batch tile of `bt` images.

    x_ref    : (bt, C, HW)   VMEM  lane-dense feature maps
    w1_ref   : (C, Cr)       VMEM  first 1x1 conv weight, channel-major (w1_ref[c,j] = W1[j,c])
    w2_ref   : (C, Cr)       VMEM  second 1x1 conv weight                (w2_ref[c,j] = W2[c,j])
    amax_ref : (HW, HW)      VMEM  Toeplitz matrix of the 7x7 conv, max-plane taps
    aavg_ref : (HW, HW)      VMEM  Toeplitz matrix of the 7x7 conv, avg-plane taps
    o_ref    : (bt, C, HW)   VMEM  output
    sm_ref   : (BTP, HW)     VMEM  scratch: channel-wise max planes (rows >= bt zeroed)
    sa_ref   : (BTP, HW)     VMEM  scratch: channel-wise mean planes
    """
    _, C, HW = x_ref.shape
    btp = sm_ref.shape[0]
    inv_hw = 1.0 / float(HW)
    inv_c = 1.0 / float(C)

    w1t = w1_ref[...]                                            # (C, Cr)
    w2m = w2_ref[...]                                            # (C, Cr)

    def shared_mlp(v):                                           # (C,1) -> (C,1)
        # hidden[j] = relu(sum_c W1[j,c] * v[c])   (VPU broadcast+reduce; C, Cr << 128)
        h = jnp.maximum(jnp.sum(v * w1t, axis=0, keepdims=True), 0.0)   # (1, Cr)
        # out[c] = sum_j W2[c,j] * hidden[j]
        return jnp.sum(w2m * h, axis=1, keepdims=True)                   # (C, 1)

    # Unused (padding) rows of the pooled-plane scratch: keep them zero so the
    # batched matmul below never consumes uninitialized data.
    if btp > bt:
        sm_ref[bt:, :] = jnp.zeros((btp - bt, HW), jnp.float32)
        sa_ref[bt:, :] = jnp.zeros((btp - bt, HW), jnp.float32)

    # ---- phase 1: channel attention + channel-wise max/mean planes (per image) ----
    ca_list = []
    for b in range(bt):
        xb = x_ref[b].astype(jnp.float32)                        # (C, HW) lane-dense
        mx = jnp.max(xb, axis=1, keepdims=True)                  # (C, 1)
        av = jnp.sum(xb, axis=1, keepdims=True) * inv_hw         # (C, 1)
        ca = _sigmoid(shared_mlp(mx) + shared_mlp(av))           # (C, 1)
        ca_list.append(ca)

        xg = xb * ca                                             # channel-gated (C, HW)
        sm_ref[b:b + 1, :] = jnp.max(xg, axis=0, keepdims=True)  # (1, HW)
        sa_ref[b:b + 1, :] = jnp.sum(xg, axis=0, keepdims=True) * inv_c

    # ---- phase 2: 7x7 spatial conv as dense matmuls, batched over the tile (MXU) ----
    conv = (jnp.dot(sm_ref[...], amax_ref[...], preferred_element_type=jnp.float32)
            + jnp.dot(sa_ref[...], aavg_ref[...], preferred_element_type=jnp.float32))
    spatial = _sigmoid(conv)                                     # (BTP, HW)

    # ---- phase 3: final gating; re-derive the channel-gated image from VMEM ----
    for b in range(bt):
        xg = x_ref[b].astype(jnp.float32) * ca_list[b]           # (C, HW)
        o_ref[b] = (xg * spatial[b:b + 1, :]).astype(o_ref.dtype)


def _spatial_conv_matrices(w_spatial, H, W):
    """Dense (HW, HW) Toeplitz matrices of the padded KxK conv (weight-only precompute).

    Built by running the reference conv on one-hot planes, so tap indexing /
    padding semantics match lax.conv (and hence PyTorch) exactly.
    """
    K = w_spatial.shape[-1]
    p = K // 2
    HW = H * W
    eye = jnp.eye(HW, dtype=jnp.float32).reshape(HW, 1, H, W)

    def one(w_plane):                                            # w_plane: (K, K)
        out = lax.conv_general_dilated(
            eye, w_plane.reshape(1, 1, K, K).astype(jnp.float32),
            window_strides=(1, 1), padding=((p, p), (p, p)),
            dimension_numbers=("NCHW", "OIHW", "NCHW"),
            precision=lax.Precision.HIGHEST)
        return out.reshape(HW, HW)                               # row = src pixel, col = dst pixel

    # TODO(synk): for large H*W the dense (HW, HW) matrices become impractical;
    # switch the spatial conv to an in-kernel shift-and-accumulate there.
    return one(w_spatial[0, 0]), one(w_spatial[0, 1])


def _pick_batch_tile(n):
    """Largest divisor of n (capped at 8) that still leaves >= 2 grid steps (v7x)."""
    best = 1
    for b in range(1, min(n, 8) + 1):
        if n % b:
            continue
        if n >= 2 and n // b < 2:
            continue
        best = b
    return best


def cbam_forward(x, w1, w2, w_spatial):
    """CBAMLayer.forward as one fused pallas_call.

    x         : (N, C, H, W)
    w1        : (C//r, C)     mlp[0].weight squeezed
    w2        : (C, C//r)     mlp[2].weight squeezed
    w_spatial : (1, 2, K, K)  conv.weight (in-channel 0 = max map, 1 = avg map)
    """
    N, C, H, W = x.shape
    Cr = w1.shape[0]
    HW = H * W

    bt = _pick_batch_tile(N)
    grid = (N // bt,)
    btp = max(bt, 8)                         # pad pooled-plane rows to a full sublane tile

    # One-off, weight-only re-layouts / precompute (no feature-map data movement).
    w1t = jnp.transpose(w1.astype(jnp.float32), (1, 0))          # (C, Cr)
    w2m = w2.astype(jnp.float32)                                 # (C, Cr)
    a_max, a_avg = _spatial_conv_matrices(w_spatial, H, W)       # (HW, HW) each

    # Free (contiguous) reshape: lane-dense last dim for the kernel.
    x2 = x.reshape(N, C, HW)

    kernel = functools.partial(_cbam_kernel, bt=bt)

    cost = pl.CostEstimate(
        flops=int(N * (4 * C * HW + 4 * HW * HW + 4 * C * Cr)),
        transcendentals=int(N * (HW + 2 * C)),
        bytes_accessed=int(2 * N * C * HW * x.dtype.itemsize + 2 * HW * HW * 4),
    )

    out = pl.pallas_call(
        kernel,
        out_shape=jax.ShapeDtypeStruct((N, C, HW), x.dtype),
        grid_spec=pltpu.PrefetchScalarGridSpec(
            num_scalar_prefetch=0,
            grid=grid,
            in_specs=[
                pl.BlockSpec((bt, C, HW), lambda n: (n, 0, 0)),
                pl.BlockSpec((C, Cr), lambda n: (0, 0)),
                pl.BlockSpec((C, Cr), lambda n: (0, 0)),
                pl.BlockSpec((HW, HW), lambda n: (0, 0)),   # constant block: DMA'd once
                pl.BlockSpec((HW, HW), lambda n: (0, 0)),
            ],
            out_specs=pl.BlockSpec((bt, C, HW), lambda n: (n, 0, 0)),
            scratch_shapes=[
                pltpu.VMEM((btp, HW), jnp.float32),   # channel-wise max planes
                pltpu.VMEM((btp, HW), jnp.float32),   # channel-wise mean planes
            ],
        ),
        compiler_params=pltpu.CompilerParams(
            dimension_semantics=("parallel",),        # v7x: batch tiles across both TCs
        ),
        cost_estimate=cost,
    )(x2, w1t, w2m, a_max, a_avg)

    return out.reshape(N, C, H, W)


def cbam_reference(x, w1, w2, w_spatial):
    """Pure-JAX reference matching PyTorch CBAMLayer.forward."""
    x = x.astype(jnp.float32)

    def shared_mlp(v):                                            # v: (N, C)
        h = jnp.maximum(jnp.sum(v[:, None, :] * w1[None, :, :], axis=2), 0.0)   # (N, Cr)
        return jnp.sum(h[:, None, :] * w2[None, :, :], axis=2)                  # (N, C)

    mx = jnp.max(x, axis=(2, 3))
    av = jnp.mean(x, axis=(2, 3))
    ca = jax.nn.sigmoid(shared_mlp(mx) + shared_mlp(av))          # (N, C)
    xc = x * ca[:, :, None, None]

    sm = jnp.max(xc, axis=1, keepdims=True)
    sa = jnp.mean(xc, axis=1, keepdims=True)
    sin = jnp.concatenate([sm, sa], axis=1)                       # (N, 2, H, W)
    p = w_spatial.shape[-1] // 2
    conv = lax.conv_general_dilated(
        sin, w_spatial, window_strides=(1, 1), padding=((p, p), (p, p)),
        dimension_numbers=("NCHW", "OIHW", "NCHW"),
        precision=lax.Precision.HIGHEST)
    sp = jax.nn.sigmoid(conv)                                     # (N, 1, H, W)
    return xc * sp


if __name__ == "__main__":
    key = jax.random.PRNGKey(0)
    N, C, H, W = 2, 16, 16, 16          # channel=16 so channel//reduction >= 1
    reduction, spatial_kernel = 8, 7
    Cr = C // reduction

    kx, k1, k2, k3 = jax.random.split(key, 4)
    x = jax.random.normal(kx, (N, C, H, W), dtype=jnp.float32)
    w1 = 0.5 * jax.random.normal(k1, (Cr, C), dtype=jnp.float32)           # Conv2d(C, C//r, 1).weight
    w2 = 0.5 * jax.random.normal(k2, (C, Cr), dtype=jnp.float32)           # Conv2d(C//r, C, 1).weight
    w_spatial = 0.2 * jax.random.normal(
        k3, (1, 2, spatial_kernel, spatial_kernel), dtype=jnp.float32)     # Conv2d(2, 1, 7).weight

    y = cbam_forward(x, w1, w2, w_spatial)
    y = jax.block_until_ready(y)

    y_ref = cbam_reference(x, w1, w2, w_spatial)
    assert y.shape == x.shape and y.dtype == x.dtype, (y.shape, y.dtype)
    max_err = float(jnp.max(jnp.abs(y.astype(jnp.float32) - y_ref)))
    assert max_err < 2e-3, f"max abs err vs reference: {max_err}"

    print("KERNEL_OK")
</pallas_src>

<mosaic_0001>
module attributes {stable_mosaic.version = 11 : i64} {
  func.func @_cbam_kernel(%arg0: i32, %arg1: memref<1x16x256xf32, #tpu.memory_space<vmem>>, %arg2: memref<16x2xf32, #tpu.memory_space<vmem>>, %arg3: memref<16x2xf32, #tpu.memory_space<vmem>>, %arg4: memref<256x256xf32, #tpu.memory_space<vmem>>, %arg5: memref<256x256xf32, #tpu.memory_space<vmem>>, %arg6: memref<1x16x256xf32, #tpu.memory_space<vmem>>, %arg7: memref<8x256xf32, #tpu.memory_space<vmem>>, %arg8: memref<8x256xf32, #tpu.memory_space<vmem>>) attributes {dimension_semantics = [#tpu.dimension_semantics<parallel>], iteration_bounds = array<i64: 2>, scalar_prefetch = 0 : i64, scratch_operands = 2 : i64, tpu.core_type = #tpu.core_type<tc>, window_params = [{transform_indices = @transform_0, window_bounds = array<i64: 1, 16, 256>}, {pipeline_mode = #tpu.pipeline_mode<synchronous>, transform_indices = @transform_1, window_bounds = array<i64: 16, 2>}, {pipeline_mode = #tpu.pipeline_mode<synchronous>, transform_indices = @transform_2, window_bounds = array<i64: 16, 2>}, {pipeline_mode = #tpu.pipeline_mode<synchronous>, transform_indices = @transform_3, window_bounds = array<i64: 256, 256>}, {pipeline_mode = #tpu.pipeline_mode<synchronous>, transform_indices = @transform_4, window_bounds = array<i64: 256, 256>}, {transform_indices = @transform_5, window_bounds = array<i64: 1, 16, 256>}]} {
    %c0 = arith.constant 0 : index
    %c0_0 = arith.constant 0 : index
    %0 = vector.load %arg2[%c0, %c0_0] : memref<16x2xf32, #tpu.memory_space<vmem>>, vector<16x2xf32>
    %c0_1 = arith.constant 0 : index
    %c0_2 = arith.constant 0 : index
    %1 = vector.load %arg3[%c0_1, %c0_2] : memref<16x2xf32, #tpu.memory_space<vmem>>, vector<16x2xf32>
    %cst = arith.constant 0.000000e+00 : f32
    %2 = vector.broadcast %cst : f32 to vector<7x256xf32>
    %c1 = arith.constant 1 : index
    %c0_3 = arith.constant 0 : index
    %3 = vector.load %arg7[%c1, %c0_3] : memref<8x256xf32, #tpu.memory_space<vmem>>, vector<7x256xf32>
    tpu.vector_store %arg7[%c1, %c0_3], %2 {strides = array<i32>} : memref<8x256xf32, #tpu.memory_space<vmem>>, vector<7x256xf32>,
    %cst_4 = arith.constant 0.000000e+00 : f32
    %4 = vector.broadcast %cst_4 : f32 to vector<7x256xf32>
    %c1_5 = arith.constant 1 : index
    %c0_6 = arith.constant 0 : index
    %5 = vector.load %arg8[%c1_5, %c0_6] : memref<8x256xf32, #tpu.memory_space<vmem>>, vector<7x256xf32>
    tpu.vector_store %arg8[%c1_5, %c0_6], %4 {strides = array<i32>} : memref<8x256xf32, #tpu.memory_space<vmem>>, vector<7x256xf32>,
    %c0_7 = arith.constant 0 : index
    %c0_8 = arith.constant 0 : index
    %c0_9 = arith.constant 0 : index
    %6 = vector.load %arg1[%c0_7, %c0_8, %c0_9] : memref<1x16x256xf32, #tpu.memory_space<vmem>>, vector<1x16x256xf32>
    %7 = vector.shape_cast %6 : vector<1x16x256xf32> to vector<16x256xf32>
    %cst_10 = arith.constant dense<0xFF800000> : vector<16xf32>
    %8 = vector.multi_reduction <maximumf>, %7, %cst_10 [1] : vector<16x256xf32> to vector<16xf32>
    %9 = vector.shape_cast %8 : vector<16xf32> to vector<16x1xf32>
    %cst_11 = arith.constant dense<0.000000e+00> : vector<16xf32>
    %10 = vector.multi_reduction <add>, %7, %cst_11 [1] : vector<16x256xf32> to vector<16xf32>
    %11 = vector.shape_cast %10 : vector<16xf32> to vector<16x1xf32>
    %cst_12 = arith.constant 3.906250e-03 : f32
    %12 = vector.broadcast %cst_12 : f32 to vector<16x1xf32>
    %13 = arith.mulf %11, %12 : vector<16x1xf32>
    %14 = vector.broadcast %9 : vector<16x1xf32> to vector<16x2xf32>
    %15 = arith.mulf %14, %0 : vector<16x2xf32>
    %cst_13 = arith.constant dense<0.000000e+00> : vector<2xf32>
    %16 = vector.multi_reduction <add>, %15, %cst_13 [0] : vector<16x2xf32> to vector<2xf32>
    %17 = vector.shape_cast %16 : vector<2xf32> to vector<1x2xf32>
    %cst_14 = arith.constant 0.000000e+00 : f32
    %18 = vector.broadcast %cst_14 : f32 to vector<1x2xf32>
    %19 = arith.maximumf %17, %18 : vector<1x2xf32>
    %20 = vector.broadcast %19 : vector<1x2xf32> to vector<16x2xf32>
    %21 = arith.mulf %1, %20 : vector<16x2xf32>
    %cst_15 = arith.constant dense<0.000000e+00> : vector<16xf32>
    %22 = vector.multi_reduction <add>, %21, %cst_15 [1] : vector<16x2xf32> to vector<16xf32>
    %23 = vector.shape_cast %22 : vector<16xf32> to vector<16x1xf32>
    %24 = vector.broadcast %13 : vector<16x1xf32> to vector<16x2xf32>
    %25 = arith.mulf %24, %0 : vector<16x2xf32>
    %cst_16 = arith.constant dense<0.000000e+00> : vector<2xf32>
    %26 = vector.multi_reduction <add>, %25, %cst_16 [0] : vector<16x2xf32> to vector<2xf32>
    %27 = vector.shape_cast %26 : vector<2xf32> to vector<1x2xf32>
    %cst_17 = arith.constant 0.000000e+00 : f32
    %28 = vector.broadcast %cst_17 : f32 to vector<1x2xf32>
    %29 = arith.maximumf %27, %28 : vector<1x2xf32>
    %30 = vector.broadcast %29 : vector<1x2xf32> to vector<16x2xf32>
    %31 = arith.mulf %1, %30 : vector<16x2xf32>
    %cst_18 = arith.constant dense<0.000000e+00> : vector<16xf32>
    %32 = vector.multi_reduction <add>, %31, %cst_18 [1] : vector<16x2xf32> to vector<16xf32>
    %33 = vector.shape_cast %32 : vector<16xf32> to vector<16x1xf32>
    %34 = arith.addf %23, %33 : vector<16x1xf32>
    %cst_19 = arith.constant 0.000000e+00 : f32
    %35 = vector.broadcast %cst_19 : f32 to vector<16x1xf32>
    %36 = arith.subf %35, %34 : vector<16x1xf32>
    %37 = math.exp %36 : vector<16x1xf32>
    %cst_20 = arith.constant 1.000000e+00 : f32
    %38 = vector.broadcast %cst_20 : f32 to vector<16x1xf32>
    %39 = arith.addf %38, %37 : vector<16x1xf32>
    %cst_21 = arith.constant 1.000000e+00 : f32
    %40 = vector.broadcast %cst_21 : f32 to vector<16x1xf32>
    %41 = arith.divf %40, %39 : vector<16x1xf32>
    %42 = vector.broadcast %41 : vector<16x1xf32> to vector<16x256xf32>
    %43 = arith.mulf %7, %42 : vector<16x256xf32>
    %cst_22 = arith.constant dense<0xFF800000> : vector<256xf32>
    %44 = vector.multi_reduction <maximumf>, %43, %cst_22 [0] : vector<16x256xf32> to vector<256xf32>
    %45 = vector.shape_cast %44 : vector<256xf32> to vector<1x256xf32>
    %c0_23 = arith.constant 0 : index
    %c0_24 = arith.constant 0 : index
    %46 = vector.load %arg7[%c0_23, %c0_24] : memref<8x256xf32, #tpu.memory_space<vmem>>, vector<1x256xf32>
    tpu.vector_store %arg7[%c0_23, %c0_24], %45 {strides = array<i32>} : memref<8x256xf32, #tpu.memory_space<vmem>>, vector<1x256xf32>,
    %cst_25 = arith.constant dense<0.000000e+00> : vector<256xf32>
    %47 = vector.multi_reduction <add>, %43, %cst_25 [0] : vector<16x256xf32> to vector<256xf32>
    %48 = vector.shape_cast %47 : vector<256xf32> to vector<1x256xf32>
    %cst_26 = arith.constant 6.250000e-02 : f32
    %49 = vector.broadcast %cst_26 : f32 to vector<1x256xf32>
    %50 = arith.mulf %48, %49 : vector<1x256xf32>
    %c0_27 = arith.constant 0 : index
    %c0_28 = arith.constant 0 : index
    %51 = vector.load %arg8[%c0_27, %c0_28] : memref<8x256xf32, #tpu.memory_space<vmem>>, vector<1x256xf32>
    tpu.vector_store %arg8[%c0_27, %c0_28], %50 {strides = array<i32>} : memref<8x256xf32, #tpu.memory_space<vmem>>, vector<1x256xf32>,
    %c0_29 = arith.constant 0 : index
    %c0_30 = arith.constant 0 : index
    %52 = vector.load %arg7[%c0_29, %c0_30] : memref<8x256xf32, #tpu.memory_space<vmem>>, vector<8x256xf32>
    %c0_31 = arith.constant 0 : index
    %c0_32 = arith.constant 0 : index
    %53 = vector.load %arg4[%c0_31, %c0_32] : memref<256x256xf32, #tpu.memory_space<vmem>>, vector<256x256xf32>
    %cst_33 = arith.constant dense<0.000000e+00> : vector<8x256xf32>
    %54 = tpu.matmul %52, %53, %cst_33 {dimension_numbers = #tpu.dot_dimension_numbers<[1], [0], [0], [1], [0, 0, 1, 1], [], []>} : vector<8x256xf32>, vector<256x256xf32>, vector<8x256xf32> -> vector<8x256xf32>
    %c0_34 = arith.constant 0 : index
    %c0_35 = arith.constant 0 : index
    %55 = vector.load %arg8[%c0_34, %c0_35] : memref<8x256xf32, #tpu.memory_space<vmem>>, vector<8x256xf32>
    %c0_36 = arith.constant 0 : index
    %c0_37 = arith.constant 0 : index
    %56 = vector.load %arg5[%c0_36, %c0_37] : memref<256x256xf32, #tpu.memory_space<vmem>>, vector<256x256xf32>
    %cst_38 = arith.constant dense<0.000000e+00> : vector<8x256xf32>
    %57 = tpu.matmul %55, %56, %cst_38 {dimension_numbers = #tpu.dot_dimension_numbers<[1], [0], [0], [1], [0, 0, 1, 1], [], []>} : vector<8x256xf32>, vector<256x256xf32>, vector<8x256xf32> -> vector<8x256xf32>
    %58 = arith.addf %54, %57 : vector<8x256xf32>
    %cst_39 = arith.constant 0.000000e+00 : f32
    %59 = vector.broadcast %cst_39 : f32 to vector<8x256xf32>
    %60 = arith.subf %59, %58 : vector<8x256xf32>
    %61 = math.exp %60 : vector<8x256xf32>
    %cst_40 = arith.constant 1.000000e+00 : f32
    %62 = vector.broadcast %cst_40 : f32 to vector<8x256xf32>
    %63 = arith.addf %62, %61 : vector<8x256xf32>
    %cst_41 = arith.constant 1.000000e+00 : f32
    %64 = vector.broadcast %cst_41 : f32 to vector<8x256xf32>
    %65 = arith.divf %64, %63 : vector<8x256xf32>
    %c0_42 = arith.constant 0 : index
    %c0_43 = arith.constant 0 : index
    %c0_44 = arith.constant 0 : index
    %66 = vector.load %arg1[%c0_42, %c0_43, %c0_44] : memref<1x16x256xf32, #tpu.memory_space<vmem>>, vector<1x16x256xf32>
    %67 = vector.shape_cast %66 : vector<1x16x256xf32> to vector<16x256xf32>
    %68 = vector.broadcast %41 : vector<16x1xf32> to vector<16x256xf32>
    %69 = arith.mulf %67, %68 : vector<16x256xf32>
    %70 = vector.extract_strided_slice %65 {offsets = [0, 0], sizes = [1, 256], strides = [1, 1]} : vector<8x256xf32> to vector<1x256xf32>
    %71 = vector.broadcast %70 : vector<1x256xf32> to vector<16x256xf32>
    %72 = arith.mulf %69, %71 : vector<16x256xf32>
    %c0_45 = arith.constant 0 : index
    %c0_46 = arith.constant 0 : index
    %c0_47 = arith.constant 0 : index
    %73 = vector.load %arg6[%c0_45, %c0_46, %c0_47] : memref<1x16x256xf32, #tpu.memory_space<vmem>>, vector<1x16x256xf32>
    %74 = vector.shape_cast %73 : vector<1x16x256xf32> to vector<16x256xf32>
    %75 = vector.shape_cast %72 : vector<16x256xf32> to vector<1x16x256xf32>
    tpu.vector_store %arg6[%c0_45, %c0_46, %c0_47], %75 {strides = array<i32>} : memref<1x16x256xf32, #tpu.memory_space<vmem>>, vector<1x16x256xf32>,
    return
  }
  func.func @transform_0(%arg0: i32) -> (i32, i32, i32) {
    %c0_i32 = arith.constant 0 : i32
    %c0_i32_0 = arith.constant 0 : i32
    %c0_i32_1 = arith.constant 0 : i32
    return %arg0, %c0_i32, %c0_i32_0 : i32, i32, i32
  }
  func.func @transform_1(%arg0: i32) -> (i32, i32) {
    %c0_i32 = arith.constant 0 : i32
    %c0_i32_0 = arith.constant 0 : i32
    %c0_i32_1 = arith.constant 0 : i32
    return %c0_i32, %c0_i32_0 : i32, i32
  }
  func.func @transform_2(%arg0: i32) -> (i32, i32) {
    %c0_i32 = arith.constant 0 : i32
    %c0_i32_0 = arith.constant 0 : i32
    %c0_i32_1 = arith.constant 0 : i32
    return %c0_i32, %c0_i32_0 : i32, i32
  }
  func.func @transform_3(%arg0: i32) -> (i32, i32) {
    %c0_i32 = arith.constant 0 : i32
    %c0_i32_0 = arith.constant 0 : i32
    %c0_i32_1 = arith.constant 0 : i32
    return %c0_i32, %c0_i32_0 : i32, i32
  }
  func.func @transform_4(%arg0: i32) -> (i32, i32) {
    %c0_i32 = arith.constant 0 : i32
    %c0_i32_0 = arith.constant 0 : i32
    %c0_i32_1 = arith.constant 0 : i32
    return %c0_i32, %c0_i32_0 : i32, i32
  }
  func.func @transform_5(%arg0: i32) -> (i32, i32, i32) {
    %c0_i32 = arith.constant 0 : i32
    %c0_i32_0 = arith.constant 0 : i32
    %c0_i32_1 = arith.constant 0 : i32
    return %arg0, %c0_i32, %c0_i32_0 : i32, i32, i32
  }
}

</mosaic_0001>

<bundles_post_ra>
// kernel: tpu_custom_call.1
= control target key start
LH: loop header
LB: loop body
LE: loop exit
PB: predicated region body
PF: predicated region fallthrough
CT: control target
= control target key end

     0   :  { %10 = vsyncpa [#allocation5], 0  ;;  %s1453_s0 = inlined_call_operand.hbm [shape: f32[2,16,256], index: 0, kind: input, shape index: {}]   ;;  %s1454_s1 = inlined_call_operand.vmem [shape: f32[16,2], index: 1, kind: input, shape index: {}]   ;;  %s1455_s2 = inlined_call_operand.vmem [shape: f32[16,2], index: 2, kind: input, shape index: {}]   ;;  %s1456_s3 = inlined_call_operand.hbm [shape: f32[256,256], index: 3, kind: input, shape index: {}]   ;;  %s1457_s4 = inlined_call_operand.hbm [shape: f32[256,256], index: 4, kind: input, shape index: {}]   ;;  %s1458_s5 = inlined_call_operand.hbm [shape: f32[2,16,256], index: 5, kind: output, shape index: {}]  }
   0x1   :  { %12 = vsyncpa [#allocation5 + $0x1], 0 }
   0x2   :  { %13 = vsyncpa [#allocation8], 0 }
   0x3   :  { %14 = vsyncpa [#allocation6], 0 }
   0x4   :  { %16 = vsyncpa [#allocation6 + $0x1], 0  ;;  %s1201_s18 = smov 0   ;;  %s1203_s19 = smov 0  }
   0x5   :  { %s1205_s20 = smov 0   ;;  %s1207_s21 = smov 0  }
   0x6 LB: > { %s1222_s22 = sadd.s32 4294967295, %s1162_s21   ;;  %s894_s23 = sadd.s32 4294967294, %s1162_s21   ;;  %s1162_s21 = sphi %s1207_s21, %s1472_s21   ;;  %s1158_s20 = sphi %s1205_s20, %s1471_s20   ;;  %s1154_s19 = sphi %s1203_s19, %s1470_s19   ;;  %s1150_s18 = sphi %s1201_s18, %s1469_s18  }
   0x7   : > { %p42_p0 = scmp.ne.s32.totalorder %s1154_s19, %s1150_s18  ;;  %p43_p1 = scmp.eq.s32.totalorder %s1222_s22, 0 }
   0x8   : > { %p150_p2 = scmp.eq.s32.totalorder %s1222_s22, 1  ;;  %p156_p3 = scmp.eq.s32.totalorder %s894_s23, 1 }
   0x9   : > { %p1231_p4 = por %p43_p1, %p42_p0  ;;  %p895_p5 = scmp.ge.s32.totalorder %s1162_s21, 1 }
   0xa   : > { %p1236_p6 = por %p156_p3, %p42_p0  ;;  %p163_p7 = scmp.lt.s32.totalorder %s1162_s21, 3 }
   0xb   : > { %s180_s28 = sshll.u32 %s1456_s3, 4  ;;  %s1164_s30 = smov [#allocation7]   ;;  %s181_s28 = int_to_ptr.hbm [resolvable:$true] %s180_s28 }
   0xc   : > { %p1244_p8 = pnand %p895_p5, %p163_p7  ;;  %s182_s6 = sshll.u32 %s1164_s30, 4  ;;  %s183_s6 = int_to_ptr.vmem [resolvable:$true] %s182_s6 }
   0xd   : > { %s194_s9 = sshll.u32 %s1457_s4, 4  ;;  %s1459_s10 = smov 256   ;;  %s195_s9 = int_to_ptr.hbm [resolvable:$true] %s194_s9 }
   0xe   : > { %p926_p9 = pneg %p1244_p8  ;;  %s1166_s11 = smov 16  }
   0xf   : > { %s1167_s12 = smov [#allocation9]   ;;  %s1263_s14 = sadd.s32 1, %s1162_s21  }
  0x10   : > { %p927_p10 = pnand %p926_p9, %p43_p1  ;;  %s196_s13 = sshll.u32 %s1167_s12, 4  ;;  %s197_s13 = int_to_ptr.vmem [resolvable:$true] %s196_s13 }
  0x11   : > { %s29_s15 = sadd.s32 1, %s1158_s20  ;;  %s26_s16 = ssub.s32 %s1162_s21, %s1263_s14 }
  0x12   : > { %929 = dma.hbm_to_vmem [thread:$0]  (!%p927_p10), %s181_s28, 8192, %s183_s6, [#allocation8], %s1459_s10, %s1459_s10, %s1166_s11  }
  0x13   : > { %932 = dma.hbm_to_vmem [thread:$0]  (!%p927_p10), %s195_s9, 8192, %s197_s13, [#allocation8], %s1459_s10, %s1459_s10, %s1166_s11  }
  0x14   : > { %p36_p12 = scmp.ne.s32.totalorder %s1158_s20, %s1154_s19  ;;  %p27_p13 = scmp.eq.s32.totalorder %s26_s16, 0 }
  0x15   : > { %p37_p0 = scmp.eq.s32.totalorder %s1162_s21, 0  ;;  %p943_p5 = scmp.lt.s32.totalorder %s1162_s21, 2 }
  0x16   : > { %p1273_p3 = por %p150_p2, %p36_p12  ;;  %s210_s26 = sand.u32 1, %s1158_s20  }
  0x17   : > { %s1279_s23 = scalar_select %p27_p13, %s1158_s20, %s29_s15  }
  0x18   : > { %p38_p7 = por %p37_p0, %p36_p12  ;;  %s899_s27 = sshll.u32 %s210_s26, 5 }
  0x19   : > { %s912_s28 = sshll.u32 %s1162_s21, 5  ;;  %s214_s8 = scalar_lea.vmem [#allocation4], %s899_s27 }
  0x1a   : > { %s219_s7 = scalar_lea.hbm %s1453_s0, %s912_s28  ;;  %s222_s9 = sshll.u32 %s214_s8, 4  ;;  %s223_s9 = int_to_ptr.vmem [resolvable:$true] %s222_s9 }
  0x1b   : > { %s220_s12 = sshll.u32 %s219_s7, 4  ;;  %p1286_p2 = pnand %p943_p5, %p38_p7  ;;  %s221_s12 = int_to_ptr.hbm [resolvable:$true] %s220_s12 }
  0x1c   : > { %s211_s15 = scalar_lea.sflag [#allocation5], %s210_s26  ;;  %s1062_s16 = sshra.s32 %s221_s12, 4  ;;  %s1063_s16 = int_to_ptr.hbm [resolvable:$true] %s1062_s16 }
  0x1d   : > { %s1064_s10 = scalar_lea.hbm %s1063_s16, 32  ;;  %p1066_p10 = pneg %p1286_p2 }
  0x1e   : > { %p1065_p9 = scmp.ne.s32.totalorder %s1063_s16, %s1064_s10  ;;  %s1069_s30 = scalar_lea.hbm %s1453_s0, 64 }
  0x1f   : > { %p1070_p0 = scmp.lt.s32.totalorder %s1063_s16, %s1453_s0  ;;  %p1071_p5 = scmp.lt.s32.totalorder %s1069_s30, %s1064_s10 }
  0x20   : > { %p1067_p12 = pnand %p1066_p10, %p1065_p9 }
  0x21   : > { %p1072_p7 = por %p1071_p5, %p1070_p0 }
  0x22   : > { %p1068_p13 = pneg %p1067_p12 }
  0x24   : > { %p1073_p11 = pnand %p1072_p7, %p1068_p13 }
  0x26   : > { %1076 = shalt.err (!%p1073_p11)
}
  0x27   : > { %s1465_s26 = smov 256   ;;  %234 = sbr.rel (%p1244_p8) target bundleno = 565 (0x235), region = 40 }
  0x28   : > { %936 = dma.hbm_to_vmem [thread:$0]  (!%p1286_p2), %s221_s12, 512, %s223_s9, %s211_s15, %s1465_s26, %s1465_s26, %s1166_s11  }
  0x29   : > { %s1306_s8 = sand.u32 (!%p1244_p8), 1, %s1154_s19  }
  0x2a   : > { %s903_s10 = sshll.u32 (!%p1244_p8), %s1306_s8, 5  ;;  %s237_s16 = scalar_lea.sflag (!%p1244_p8), [#allocation5], %s1306_s8 }
  0x2b   : > { %s240_s28 = scalar_lea.vmem (!%p1244_p8), [#allocation4], %s903_s10 }
  0x2c   : > { %1137 = dma.done.wait (%p1231_p4), %s237_s16, 512  }
  0x2d   : > { %1139 = vsyncadd (%p1231_p4), %s237_s16, 4294966784 }
  0x2e   : > { %1141 = dma.done.wait (%p43_p1), [#allocation8], 16384  }
  0x2f   : > { %1143 = vsyncadd (%p43_p1), [#allocation8], 4294950912  ;;  %v1320_v0 = vld [vmem:[%s240_s28] sm:$0xff]  ;;  %v1322_v1 = vld [vmem:[%s240_s28 + $0x8] sm:$0xff]  ;;  %vm306_vm0 = vcmask 15360   ;;  %vm406_vm9 = vcmask 1040384  }
  0x30   : > { %v296_v2 = vadd.f32 %v1322_v1, %v1320_v0  ;;  %v290_v3 = vmax.f32 %v1320_v0, %v1322_v1  ;;  %v1328_v4 = vld [vmem:[%s240_s28 + $0x10] sm:$0xff]  ;;  %v1330_v5 = vld [vmem:[%s240_s28 + $0x18] sm:$0xff]  ;;  %v278_v10 = vld [vmem:[%s1454_s1] sm:$0xff]  ;;  %s913_s30 = sshll.u32 %s1222_s22, 5  ;;  %s277_s16 = scalar_lea.vmem [#allocation10], %s903_s10 }
  0x31   : > { %v299_v6 = vadd.f32 %v1330_v5, %v1328_v4  ;;  %v293_v7 = vmax.f32 %v1328_v4, %v1330_v5  ;;  %v279_v12 = vld [vmem:[%s1454_s1 + $0x8] sm:$0xff]  ;;  %v280_v37 = vld [vmem:[%s1455_s2] sm:$0xff]  ;;  %v536_v50 = vld [vmem:[#allocation9 + $0xf0] sm:$0xff]  ;;  %s798_s26 = scalar_lea.hbm %s1458_s5, %s913_s30  ;;  %s799_s22 = sshll.u32 %s277_s16, 4  ;;  %s800_s22 = int_to_ptr.vmem [resolvable:$true] %s799_s22 }
  0x32   : > { %297 = vadd.xlane.f32.xlu0 %v296_v2  ;;  %291 = vmax.xlane.f32.xlu1 %v290_v3  ;;  %v281_v42 = vld [vmem:[%s1455_s2 + $0x8] sm:$0xff]  ;;  %v568_v51 = vld [vmem:[#allocation9 + $0x1f0] sm:$0xff]  ;;  %v537_v52 = vld [vmem:[#allocation9 + $0xf8] sm:$0xff]  ;;  %s801_s28 = sshll.u32 %s798_s26, 4  ;;  %s787_s24 = scalar_lea.sflag [#allocation6], %s1306_s8  ;;  %s802_s28 = int_to_ptr.hbm [resolvable:$true] %s801_s28 }
  0x33   : > { %570 = vmatpush.msra.mxu0 %v536_v50  ;;  %590 = vmatpush.msra.mxu1 %v568_v51  ;;  %v569_v53 = vld [vmem:[#allocation9 + $0x1f8] sm:$0xff]  ;;  %v534_v54 = vld [vmem:[#allocation9 + $0xe0] sm:$0xff]  ;;  %v535_v56 = vld [vmem:[#allocation9 + $0xe8] sm:$0xff]  ;;  %s1106_s29 = sshra.s32 %s802_s28, 4  ;;  %s1112_s12 = scalar_lea.hbm %s1458_s5, 64  ;;  %s1107_s29 = int_to_ptr.hbm [resolvable:$true] %s1106_s29 }
  0x34   : > { %610 = vmatpush.msra.mxu2 %v537_v52  ;;  %630 = vmatpush.msra.mxu3 %v569_v53  ;;  %v566_v55 = vld [vmem:[#allocation9 + $0x1e0] sm:$0xff]  ;;  %v567_v57 = vld [vmem:[#allocation9 + $0x1e8] sm:$0xff]  ;;  %v532_v58 = vld [vmem:[#allocation9 + $0xd0] sm:$0xff]  ;;  %s1108_s10 = scalar_lea.hbm %s1107_s29, 32  ;;  %p1113_p11 = scmp.lt.s32.totalorder %s1107_s29, %s1458_s5 }
  0x35   : > { %571 = vmatpush.msra.mxu0 %v534_v54  ;;  %591 = vmatpush.msra.mxu1 %v566_v55  ;;  %v564_v59 = vld [vmem:[#allocation9 + $0x1d0] sm:$0xff]  ;;  %v533_v60 = vld [vmem:[#allocation9 + $0xd8] sm:$0xff]  ;;  %v530_v62 = vld [vmem:[#allocation9 + $0xc0] sm:$0xff]  ;;  %p1109_p1 = scmp.ne.s32.totalorder %s1107_s29, %s1108_s10  ;;  %p1114_p2 = scmp.lt.s32.totalorder %s1112_s12, %s1108_s10 }
  0x36   : > { %611 = vmatpush.msra.mxu2 %v535_v56  ;;  %631 = vmatpush.msra.mxu3 %v567_v57  ;;  %v565_v61 = vld [vmem:[#allocation9 + $0x1d8] sm:$0xff]  ;;  %v562_v63 = vld [vmem:[#allocation9 + $0x1c0] sm:$0xff]  ;;  %v531_v2 = vld [vmem:[#allocation9 + $0xc8] sm:$0xff] }
  0x37   : > { %572 = vmatpush.msra.mxu0 %v532_v58  ;;  %592 = vmatpush.msra.mxu1 %v564_v59  ;;  %v563_v3 = vld [vmem:[#allocation9 + $0x1c8] sm:$0xff]  ;;  %v510_v50 = vld [vmem:[#allocation9 + $0x20] sm:$0xff]  ;;  %v508_v55 = vld [vmem:[#allocation9 + $0x10] sm:$0xff]  ;;  %p1110_p4 = pnand %p1109_p1, %p1273_p3  ;;  %p1115_p9 = por %p1114_p2, %p1113_p11 }
  0x38   : > { %612 = vmatpush.msra.mxu2 %v533_v60  ;;  %632 = vmatpush.msra.mxu3 %v565_v61  ;;  %v542_v51 = vld [vmem:[#allocation9 + $0x120] sm:$0xff]  ;;  %v511_v52 = vld [vmem:[#allocation9 + $0x28] sm:$0xff]  ;;  %v540_v56 = vld [vmem:[#allocation9 + $0x110] sm:$0xff] }
  0x39   : > { %573 = vmatpush.msra.mxu0 %v530_v62  ;;  %593 = vmatpush.msra.mxu1 %v562_v63  ;;  %v543_v54 = vld [vmem:[#allocation9 + $0x128] sm:$0xff]  ;;  %v509_v57 = vld [vmem:[#allocation9 + $0x18] sm:$0xff]  ;;  %v506_v60 = vld [vmem:[#allocation9] sm:$0xff]  ;;  %p1111_p8 = pneg %p1110_p4 }
  0x3a   : > { %300 = vadd.xlane.f32.xlu0 %v299_v6  ;;  %294 = vmax.xlane.f32.xlu1 %v293_v7  ;;  %v528_v6 = vld [vmem:[#allocation9 + $0xb0] sm:$0xff]  ;;  %v541_v59 = vld [vmem:[#allocation9 + $0x118] sm:$0xff]  ;;  %v538_v61 = vld [vmem:[#allocation9 + $0x100] sm:$0xff] }
  0x3b   : > { %613 = vmatpush.msra.mxu2 %v531_v2  ;;  %633 = vmatpush.msra.mxu3 %v563_v3  ;;  %v560_v7 = vld [vmem:[#allocation9 + $0x1b0] sm:$0xff]  ;;  %v507_v62 = vld [vmem:[#allocation9 + $0x8] sm:$0xff]  ;;  %p1116_p10 = pnand %p1115_p9, %p1111_p8 }
  0x3c   : > { %574 = vmatpush.msra.mxu0 %v528_v6  ;;  %594 = vmatpush.msra.mxu1 %v560_v7  ;;  %v539_v2 = vld [vmem:[#allocation9 + $0x108] sm:$0xff]  ;;  %v470_v3 = vld [vmem:[#allocation7 + $0xf0] sm:$0xff] }
  0x3d   : > { %v502_v6 = vld [vmem:[#allocation7 + $0x1f0] sm:$0xff] }
  0xa5   : > { %v298_v8 = vpop.xlane.xlu0 %297  ;;  %v292_v9 = vpop.xlane.xlu1 %291 }
  0xa6   : > { %v302_v11 = vmul.f32 0.00390625, %v298_v8  ;;  %v304_v13 = vmul.f32 %v292_v9, %v278_v10  ;;  %v529_v8 = vld [vmem:[#allocation9 + $0xb8] sm:$0xff] }
  0xa7   : > { %v561_v9 = vld [vmem:[#allocation9 + $0x1b8] sm:$0xff]  ;;  %614 = vmatpush.msra.mxu2 %v529_v8 }
  0xa8   : > { %v325_v16 = vmul.f32 %v302_v11, %v278_v10  ;;  %v307_v19 = vsel %vm306_vm0, %v304_v13, 0.0  ;;  %634 = vmatpush.msra.mxu3 %v561_v9  ;;  %v526_v10 = vld [vmem:[#allocation9 + $0xa0] sm:$0xff]  ;;  %v559_v13 = vld [vmem:[#allocation9 + $0x1a8] sm:$0xff]  ;;  %v471_v8 = vld [vmem:[#allocation7 + $0xf8] sm:$0xff] }
  0xa9   : > { %v558_v11 = vld [vmem:[#allocation9 + $0x1a0] sm:$0xff]  ;;  %575 = vmatpush.msra.mxu0 %v526_v10  ;;  %v503_v9 = vld [vmem:[#allocation7 + $0x1f8] sm:$0xff] }
  0xaa   : > { %v327_v23 = vsel %vm306_vm0, %v325_v16, 0.0  ;;  %595 = vmatpush.msra.mxu1 %v558_v11  ;;  %635 = vmatpush.msra.mxu3 %v559_v13  ;;  %v525_v16 = vld [vmem:[#allocation9 + $0x98] sm:$0xff]  ;;  %v468_v10 = vld [vmem:[#allocation7 + $0xe0] sm:$0xff]  ;;  %v501_v13 = vld [vmem:[#allocation7 + $0x1e8] sm:$0xff] }
  0xab   : > { %v500_v11 = vld [vmem:[#allocation7 + $0x1e0] sm:$0xff] }
  0xad   : > { %v301_v14 = vpop.xlane.xlu0 %300  ;;  %v295_v15 = vpop.xlane.xlu1 %294 }
  0xae   : > { %v303_v17 = vmul.f32 0.00390625, %v301_v14  ;;  %v305_v18 = vmul.f32 %v295_v15, %v279_v12  ;;  %v524_v14 = vld [vmem:[#allocation9 + $0x90] sm:$0xff] }
  0xaf   : > { %v556_v15 = vld [vmem:[#allocation9 + $0x190] sm:$0xff]  ;;  %576 = vmatpush.msra.mxu0 %v524_v14 }
  0xb0   : > { %v308_v20 = vsel %vm306_vm0, %v305_v18, 0.0  ;;  %v326_v21 = vmul.f32 %v303_v17, %v279_v12  ;;  %v527_v12 = vld [vmem:[#allocation9 + $0xa8] sm:$0xff]  ;;  %596 = vmatpush.msra.mxu1 %v556_v15  ;;  %v557_v17 = vld [vmem:[#allocation9 + $0x198] sm:$0xff]  ;;  %v522_v18 = vld [vmem:[#allocation9 + $0x80] sm:$0xff] }
  0xb1   : > { %v309_v22 = vadd.f32 %v308_v20, %v307_v19  ;;  %615 = vmatpush.msra.mxu2 %v527_v12  ;;  %636 = vmatpush.msra.mxu3 %v557_v17  ;;  %v554_v19 = vld [vmem:[#allocation9 + $0x180] sm:$0xff]  ;;  %v523_v20 = vld [vmem:[#allocation9 + $0x88] sm:$0xff]  ;;  %v466_v14 = vld [vmem:[#allocation7 + $0xd0] sm:$0xff] }
  0xb2   : > { %v328_v24 = vsel %vm306_vm0, %v326_v21, 0.0  ;;  %577 = vmatpush.msra.mxu0 %v522_v18  ;;  %597 = vmatpush.msra.mxu1 %v554_v19  ;;  %v555_v21 = vld [vmem:[#allocation9 + $0x188] sm:$0xff]  ;;  %v498_v15 = vld [vmem:[#allocation7 + $0x1d0] sm:$0xff]  ;;  %v499_v17 = vld [vmem:[#allocation7 + $0x1d8] sm:$0xff] }
  0xb3   : > { %v310_v25 = vrot.slane %v309_v22, 4  ;;  %v329_v26 = vadd.f32 %v328_v24, %v327_v23  ;;  %616 = vmatpush.msra.mxu2 %v525_v16  ;;  %637 = vmatpush.msra.mxu3 %v555_v21  ;;  %v520_v23 = vld [vmem:[#allocation9 + $0x70] sm:$0xff]  ;;  %v469_v12 = vld [vmem:[#allocation7 + $0xe8] sm:$0xff]  ;;  %v467_v16 = vld [vmem:[#allocation7 + $0xd8] sm:$0xff] }
  0xb4   : > { %v552_v24 = vld [vmem:[#allocation9 + $0x170] sm:$0xff]  ;;  %578 = vmatpush.msra.mxu0 %v520_v23  ;;  %v464_v19 = vld [vmem:[#allocation7 + $0xc0] sm:$0xff]  ;;  %v465_v21 = vld [vmem:[#allocation7 + $0xc8] sm:$0xff] }
  0xb5   : > { %v311_v27 = vadd.f32 %v310_v25, %v309_v22  ;;  %v330_v28 = vrot.slane %v329_v26, 4  ;;  %617 = vmatpush.msra.mxu2 %v523_v20  ;;  %v521_v25 = vld [vmem:[#allocation9 + $0x78] sm:$0xff]  ;;  %598 = vmatpush.msra.mxu1 %v552_v24  ;;  %v496_v20 = vld [vmem:[#allocation7 + $0x1c0] sm:$0xff]  ;;  %v497_v23 = vld [vmem:[#allocation7 + $0x1c8] sm:$0xff] }
  0xb6   : > { %v462_v24 = vld [vmem:[#allocation7 + $0xb0] sm:$0xff] }
  0xb7   : > { %v312_v29 = vrot.slane %v311_v27, 2  ;;  %v331_v30 = vadd.f32 %v330_v28, %v329_v26  ;;  %v553_v26 = vld [vmem:[#allocation9 + $0x178] sm:$0xff]  ;;  %618 = vmatpush.msra.mxu2 %v521_v25  ;;  %v518_v28 = vld [vmem:[#allocation9 + $0x60] sm:$0xff]  ;;  %v494_v25 = vld [vmem:[#allocation7 + $0x1b0] sm:$0xff] }
  0xb8   : > { %638 = vmatpush.msra.mxu3 %v553_v26  ;;  %579 = vmatpush.msra.mxu0 %v518_v28  ;;  %v463_v26 = vld [vmem:[#allocation7 + $0xb8] sm:$0xff] }
  0xb9   : > { %v313_v31 = vadd.f32 %v312_v29, %v311_v27  ;;  %v332_v32 = vrot.slane %v331_v30, 2  ;;  %v550_v29 = vld [vmem:[#allocation9 + $0x160] sm:$0xff]  ;;  %v495_v28 = vld [vmem:[#allocation7 + $0x1b8] sm:$0xff] }
  0xba   : > { %599 = vmatpush.msra.mxu1 %v550_v29 }
  0xbb   : > { %v314_v33 = vrot.slane %v313_v31, 1  ;;  %v333_v34 = vadd.f32 %v332_v32, %v331_v30  ;;  %v519_v30 = vld [vmem:[#allocation9 + $0x68] sm:$0xff] }
  0xbc   : > { %v551_v32 = vld [vmem:[#allocation9 + $0x168] sm:$0xff]  ;;  %619 = vmatpush.msra.mxu2 %v519_v30  ;;  %v460_v30 = vld [vmem:[#allocation7 + $0xa0] sm:$0xff] }
  0xbd   : > { %v315_v35 = vadd.f32 %v314_v33, %v313_v31  ;;  %v334_v36 = vrot.slane %v333_v34, 1  ;;  %639 = vmatpush.msra.mxu3 %v551_v32  ;;  %v516_v33 = vld [vmem:[#allocation9 + $0x50] sm:$0xff]  ;;  %v461_v32 = vld [vmem:[#allocation7 + $0xa8] sm:$0xff] }
  0xbe   : > { %580 = vmatpush.msra.mxu0 %v516_v33  ;;  %v493_v33 = vld [vmem:[#allocation7 + $0x1a8] sm:$0xff] }
  0xbf   : > { %v316_v38 = vmax.f32 %v315_v35, 0.0  ;;  %v335_v39 = vadd.f32 %v334_v36, %v333_v34  ;;  %v548_v34 = vld [vmem:[#allocation9 + $0x150] sm:$0xff]  ;;  %v517_v35 = vld [vmem:[#allocation9 + $0x58] sm:$0xff] }
  0xc0   : > { %600 = vmatpush.msra.mxu1 %v548_v34  ;;  %620 = vmatpush.msra.mxu2 %v517_v35  ;;  %v458_v35 = vld [vmem:[#allocation7 + $0x90] sm:$0xff] }
  0xc1   : > { %v317_v40 = vmul.f32 %v316_v38, %v280_v37  ;;  %v336_v41 = vmax.f32 %v335_v39, 0.0  ;;  %v318_v48 = vmul.f32 %v316_v38, %v281_v42  ;;  %v514_v38 = vld [vmem:[#allocation9 + $0x40] sm:$0xff] }
  0xc2   : > { %v546_v39 = vld [vmem:[#allocation9 + $0x140] sm:$0xff]  ;;  %581 = vmatpush.msra.mxu0 %v514_v38  ;;  %v491_v38 = vld [vmem:[#allocation7 + $0x198] sm:$0xff] }
  0xc3   : > { %v319_v43 = vsel %vm306_vm0, %v317_v40, 0.0  ;;  %v338_v44 = vmul.f32 %v336_v41, %v281_v42  ;;  %v337_v45 = vmul.f32 %v336_v41, %v280_v37  ;;  %v322_v49 = vsel %vm306_vm0, %v318_v48, 0.0  ;;  %v549_v37 = vld [vmem:[#allocation9 + $0x158] sm:$0xff]  ;;  %v515_v40 = vld [vmem:[#allocation9 + $0x48] sm:$0xff]  ;;  %601 = vmatpush.msra.mxu1 %v546_v39  ;;  %v456_v39 = vld [vmem:[#allocation7 + $0x80] sm:$0xff] }
  0xc4   : > { %320 = vadd.xlane.f32.xlu2 %v319_v43  ;;  %640 = vmatpush.msra.mxu3 %v549_v37  ;;  %v547_v42 = vld [vmem:[#allocation9 + $0x148] sm:$0xff]  ;;  %v459_v37 = vld [vmem:[#allocation7 + $0x98] sm:$0xff] }
  0xc5   : > { %v342_v46 = vsel %vm306_vm0, %v338_v44, 0.0  ;;  %v339_v47 = vsel %vm306_vm0, %v337_v45, 0.0  ;;  %621 = vmatpush.msra.mxu2 %v515_v40  ;;  %v512_v45 = vld [vmem:[#allocation9 + $0x30] sm:$0xff]  ;;  %v488_v40 = vld [vmem:[#allocation7 + $0x180] sm:$0xff] }
  0xc6   : > { %343 = vadd.xlane.f32.xlu1 %v342_v46  ;;  %340 = vadd.xlane.f32.xlu0 %v339_v47  ;;  %v544_v46 = vld [vmem:[#allocation9 + $0x130] sm:$0xff]  ;;  %v513_v47 = vld [vmem:[#allocation9 + $0x38] sm:$0xff] }
  0xc7   : > { %641 = vmatpush.msra.mxu3 %v547_v42  ;;  %582 = vmatpush.msra.mxu0 %v512_v45  ;;  %v457_v42 = vld [vmem:[#allocation7 + $0x88] sm:$0xff] }
  0xc8   : > { %602 = vmatpush.msra.mxu1 %v544_v46  ;;  %622 = vmatpush.msra.mxu2 %v513_v47  ;;  %v454_v46 = vld [vmem:[#allocation7 + $0x70] sm:$0xff] }
  0xc9   : > { %583 = vmatpush.msra.mxu0 %v510_v50  ;;  %v486_v47 = vld [vmem:[#allocation7 + $0x170] sm:$0xff]  ;;  %v487_v50 = vld [vmem:[#allocation7 + $0x178] sm:$0xff] }
  0xca   : > { %603 = vmatpush.msra.mxu1 %v542_v51  ;;  %623 = vmatpush.msra.mxu2 %v511_v52  ;;  %v452_v52 = vld [vmem:[#allocation7 + $0x60] sm:$0xff] }
  0xcb   : > { %584 = vmatpush.msra.mxu0 %v508_v55  ;;  %v484_v55 = vld [vmem:[#allocation7 + $0x160] sm:$0xff] }
  0xcc   : > { %323 = vadd.xlane.f32.xlu2 %v322_v49  ;;  %v545_v49 = vld [vmem:[#allocation9 + $0x138] sm:$0xff]  ;;  %604 = vmatpush.msra.mxu1 %v540_v56  ;;  %v453_v56 = vld [vmem:[#allocation7 + $0x68] sm:$0xff] }
  0xcd   : > { %642 = vmatpush.msra.mxu3 %v545_v49  ;;  %624 = vmatpush.msra.mxu2 %v509_v57  ;;  %v455_v49 = vld [vmem:[#allocation7 + $0x78] sm:$0xff] }
  0xce   : > { %585 = vmatpush.msra.mxu0 %v506_v60  ;;  %605 = vmatpush.msra.mxu1 %v538_v61 }
  0xcf   : > { %643 = vmatpush.msra.mxu3 %v543_v54  ;;  %625 = vmatpush.msra.mxu2 %v507_v62  ;;  %v482_v62 = vld [vmem:[#allocation7 + $0x150] sm:$0xff] }
  0xd0   : > { %650 = vmatpush.msrb.mxu0 %v470_v3  ;;  %670 = vmatpush.msrb.mxu1 %v502_v6 }
  0xd1   : > { %644 = vmatpush.msra.mxu3 %v541_v59  ;;  %690 = vmatpush.msrb.mxu2 %v471_v8  ;;  %v450_v59 = vld [vmem:[#allocation7 + $0x50] sm:$0xff]  ;;  %v448_v8 = vld [vmem:[#allocation7 + $0x40] sm:$0xff] }
  0xd2   : > { %651 = vmatpush.msrb.mxu0 %v468_v10  ;;  %671 = vmatpush.msrb.mxu1 %v500_v11  ;;  %v480_v10 = vld [vmem:[#allocation7 + $0x140] sm:$0xff]  ;;  %v449_v11 = vld [vmem:[#allocation7 + $0x48] sm:$0xff] }
  0xd3   : > { %645 = vmatpush.msra.mxu3 %v539_v2  ;;  %691 = vmatpush.msrb.mxu2 %v469_v12 }
  0xd4   : > { %652 = vmatpush.msrb.mxu0 %v466_v14  ;;  %672 = vmatpush.msrb.mxu1 %v498_v15 }
  0xd5   : > { %710 = vmatpush.msrb.mxu3 %v503_v9  ;;  %692 = vmatpush.msrb.mxu2 %v467_v16 }
  0xd6   : > { %653 = vmatpush.msrb.mxu0 %v464_v19  ;;  %673 = vmatpush.msrb.mxu1 %v496_v20  ;;  %v447_v19 = vld [vmem:[#allocation7 + $0x38] sm:$0xff] }
  0xd7   : > { %711 = vmatpush.msrb.mxu3 %v501_v13  ;;  %693 = vmatpush.msrb.mxu2 %v465_v21  ;;  %v481_v13 = vld [vmem:[#allocation7 + $0x148] sm:$0xff]  ;;  %v479_v21 = vld [vmem:[#allocation7 + $0x138] sm:$0xff] }
  0xd8   : > { %654 = vmatpush.msrb.mxu0 %v462_v24  ;;  %674 = vmatpush.msrb.mxu1 %v494_v25 }
  0xd9   : > { %712 = vmatpush.msrb.mxu3 %v499_v17  ;;  %694 = vmatpush.msrb.mxu2 %v463_v26  ;;  %v446_v17 = vld [vmem:[#allocation7 + $0x30] sm:$0xff] }
  0xda   : > { %655 = vmatpush.msrb.mxu0 %v460_v30  ;;  %v442_v30 = vld [vmem:[#allocation7 + $0x10] sm:$0xff] }
  0xdb   : > { %713 = vmatpush.msrb.mxu3 %v497_v23  ;;  %695 = vmatpush.msrb.mxu2 %v461_v32  ;;  %v443_v32 = vld [vmem:[#allocation7 + $0x18] sm:$0xff] }
  0xdc   : > { %656 = vmatpush.msrb.mxu0 %v458_v35 }
  0xdd   : > { %714 = vmatpush.msrb.mxu3 %v495_v28  ;;  %696 = vmatpush.msrb.mxu2 %v459_v37  ;;  %v445_v28 = vld [vmem:[#allocation7 + $0x28] sm:$0xff] }
  0xde   : > { %657 = vmatpush.msrb.mxu0 %v456_v39  ;;  %v472_v39 = vld [vmem:[#allocation7 + $0x100] sm:$0xff] }
  0xdf   : > { %715 = vmatpush.msrb.mxu3 %v493_v33  ;;  %697 = vmatpush.msrb.mxu2 %v457_v42  ;;  %v475_v33 = vld [vmem:[#allocation7 + $0x118] sm:$0xff] }
  0xe0   : > { %658 = vmatpush.msrb.mxu0 %v454_v46 }
  0xe1   : > { %716 = vmatpush.msrb.mxu3 %v491_v38  ;;  %698 = vmatpush.msrb.mxu2 %v455_v49  ;;  %v440_v38 = vld [vmem:[#allocation7] sm:$0xff] }
  0xe2   : > { %659 = vmatpush.msrb.mxu0 %v452_v52 }
  0xe3   : > { %699 = vmatpush.msrb.mxu2 %v453_v56 }
  0xe4   : > { %660 = vmatpush.msrb.mxu0 %v450_v59 }
  0xe6   : > { %661 = vmatpush.msrb.mxu0 %v448_v8 }
  0xe8   : > { %662 = vmatpush.msrb.mxu0 %v446_v17 }
 0x137   : > { %v321_v22 = vpop.xlane.xlu2 %320 }
 0x139   : > { %v341_v27 = vpop.xlane.xlu0 %340  ;;  %v344_v43 = vpop.xlane.xlu1 %343 }
 0x13a   : > { %v345_v31 = vadd.f32 %v341_v27, %v321_v22 }
 0x13c   : > { %v347_v36 = vsub.f32 0.0, %v345_v31  ;;  %v492_v31 = vld [vmem:[#allocation7 + $0x1a0] sm:$0xff] }
 0x13d   : > { %675 = vmatpush.msrb.mxu1 %v492_v31  ;;  %v474_v31 = vld [vmem:[#allocation7 + $0x110] sm:$0xff] }
 0x13e   : > { %v349_v41 = vmul.f32 1.442695, %v347_v36  ;;  %v490_v36 = vld [vmem:[#allocation7 + $0x190] sm:$0xff] }
 0x13f   : > { %v324_v44 = vpop.xlane.xlu2 %323  ;;  %676 = vmatpush.msrb.mxu1 %v490_v36 }
 0x140   : > { %986 = vpow2.f32 %v349_v41  ;;  %v346_v48 = vadd.f32 %v344_v43, %v324_v44  ;;  %v489_v43 = vld [vmem:[#allocation7 + $0x188] sm:$0xff]  ;;  %v1168_v44 = vmov 0.0  }
 0x141   : > { %284 = vst [vmem:[#allocation3] sm:$0xfe] %v1168_v44  ;;  %677 = vmatpush.msrb.mxu1 %v488_v40  ;;  %717 = vmatpush.msrb.mxu3 %v489_v43  ;;  %v441_v40 = vld [vmem:[#allocation7 + $0x8] sm:$0xff] }
 0x142   : > { %v348_v53 = vsub.f32 0.0, %v346_v48  ;;  %282 = vst [vmem:[#allocation2] sm:$0xfe] %v1168_v44 }
 0x143   : > { %283 = vst [vmem:[#allocation2 + $0x8] sm:$0xfe] %v1168_v44  ;;  %678 = vmatpush.msrb.mxu1 %v486_v47  ;;  %718 = vmatpush.msrb.mxu3 %v487_v50 }
 0x144   : > { %v351_v58 = vmul.f32 1.442695, %v348_v53  ;;  %285 = vst [vmem:[#allocation3 + $0x8] sm:$0xfe] %v1168_v44 }
 0x145   : > { %679 = vmatpush.msrb.mxu1 %v484_v55 }
 0x146   : > { %v987_v63 = vpop.eup %986  ;;  %988 = vpow2.f32 %v351_v58  ;;  %v485_v58 = vld [vmem:[#allocation7 + $0x168] sm:$0xff] }
 0x147   : > { %v1356_v7 = vadd.f32 1.0, %v987_v63  ;;  %v451_v63 = vld [vmem:[#allocation7 + $0x58] sm:$0xff]  ;;  %719 = vmatpush.msrb.mxu3 %v485_v58  ;;  %680 = vmatpush.msrb.mxu1 %v482_v62 }
 0x148   : > { %700 = vmatpush.msrb.mxu2 %v451_v63 }
 0x149   : > { %990 = vrcp.f32 %v1356_v7  ;;  %v366_v53 = vand.u32 2147483648, %v1356_v7  ;;  %vm360_vm2 = vweird.f32 %v1356_v7  ;;  %v364_v57 = vand.u32 2147483647, %v1356_v7  ;;  %681 = vmatpush.msrb.mxu1 %v480_v10 }
 0x14a   : > { %701 = vmatpush.msrb.mxu2 %v449_v11 }
 0x14b   : > { %v367_v9 = vor.u32 1.1754944e-38, %v366_v53  ;;  %vm365_vm5 = vcmp.eq.f32.partialorder %v364_v57, 8.507059e+37 }
 0x14c   : > { %v989_v18 = vpop.eup %988  ;;  %702 = vmatpush.msrb.mxu2 %v447_v19 }
 0x14d   : > { %v1359_v22 = vadd.f32 1.0, %v989_v18  ;;  %v478_v18 = vld [vmem:[#allocation7 + $0x130] sm:$0xff] }
 0x14e   : > { %682 = vmatpush.msrb.mxu1 %v478_v18  ;;  %703 = vmatpush.msrb.mxu2 %v445_v28 }
 0x14f   : > { %v1361_v27 = vpop.eup %990  ;;  %992 = vrcp.f32 %v1359_v22  ;;  %v381_v61 = vand.u32 2147483648, %v1359_v22  ;;  %v379_v6 = vand.u32 2147483647, %v1359_v22  ;;  %vm375_vm6 = vweird.f32 %v1359_v22 }
 0x150   : > { %v356_v29 = vmul.f32 %v1361_v27, %v1356_v7  ;;  %vm361_vm1 = vweird.f32 %v1361_v27  ;;  %v483_v7 = vld [vmem:[#allocation7 + $0x158] sm:$0xff]  ;;  %704 = vmatpush.msrb.mxu2 %v443_v32 }
 0x151   : > { %vm1378_vm3 = vmor %vm360_vm2, %vm361_vm1  ;;  %v382_v15 = vor.u32 1.1754944e-38, %v381_v61  ;;  %720 = vmatpush.msrb.mxu3 %v483_v7  ;;  %vm380_vm8 = vcmp.eq.f32.partialorder %v379_v6, 8.507059e+37 }
 0x152   : > { %v357_v34 = vsub.f32 1.0, %v356_v29  ;;  %v477_v29 = vld [vmem:[#allocation7 + $0x128] sm:$0xff]  ;;  %705 = vmatpush.msrb.mxu2 %v441_v40 }
 0x153   : > { %721 = vmatpush.msrb.mxu3 %v481_v13 }
 0x154   : > { %v358_v41 = vmul.f32 %v1361_v27, %v357_v34 }
 0x155   : > { %v1367_v45 = vpop.eup %992  ;;  %722 = vmatpush.msrb.mxu3 %v479_v21 }
 0x156   : > { %v371_v48 = vmul.f32 %v1367_v45, %v1359_v22  ;;  %v359_v51 = vadd.f32 %v1361_v27, %v358_v41  ;;  %vm376_vm4 = vweird.f32 %v1367_v45  ;;  %v444_v22 = vld [vmem:[#allocation7 + $0x20] sm:$0xff]  ;;  %v473_v41 = vld [vmem:[#allocation7 + $0x108] sm:$0xff] }
 0x157   : > { %vm377_vm7 = vmor %vm375_vm6, %vm376_vm4  ;;  %663 = vmatpush.msrb.mxu0 %v444_v22  ;;  %723 = vmatpush.msrb.mxu3 %v477_v29 }
 0x158   : > { %v372_v54 = vsub.f32 1.0, %v371_v48  ;;  %v363_v2 = vsel %vm1378_vm3, %v1361_v27, %v359_v51  ;;  %v476_v27 = vld [vmem:[#allocation7 + $0x120] sm:$0xff] }
 0x159   : > { %v368_v14 = vsel %vm365_vm5, %v367_v9, %v363_v2  ;;  %683 = vmatpush.msrb.mxu1 %v476_v27  ;;  %664 = vmatpush.msrb.mxu0 %v442_v30 }
 0x15a   : > { %v373_v3 = vmul.f32 %v1367_v45, %v372_v54  ;;  %v1395_v23 = vmul.f32 %v368_v14, %v1320_v0  ;;  %v1398_v24 = vmul.f32 %v368_v14, %v1322_v1  ;;  %724 = vmatpush.msrb.mxu3 %v475_v33  ;;  %v409_v54 = vlaneseq }
 0x15b   : > { %684 = vmatpush.msrb.mxu1 %v474_v31  ;;  %665 = vmatpush.msrb.mxu0 %v440_v38 }
 0x15c   : > { %v374_v12 = vadd.f32 %v1367_v45, %v373_v3  ;;  %725 = vmatpush.msrb.mxu3 %v473_v41  ;;  %vm411_vm10 = vcmp.lt.s32.totalorder %v409_v54, 256 }
 0x15d   : > { %685 = vmatpush.msrb.mxu1 %v472_v39 }
 0x15e   : > { %v378_v16 = vsel %vm377_vm7, %v1367_v45, %v374_v12 }
 0x15f   : > { %v383_v20 = vsel %vm380_vm8, %v382_v15, %v378_v16 }
 0x160   : > { %v1401_v25 = vmul.f32 %v383_v20, %v1328_v4  ;;  %v1404_v26 = vmul.f32 %v383_v20, %v1330_v5 }
 0x162   : > { %v389_v0 = vmax.f32 %v1395_v23, %v1401_v25  ;;  %v396_v1 = vmax.f32 %v1398_v24, %v1404_v26  ;;  %v415_v4 = vadd.f32 %v1401_v25, %v1395_v23  ;;  %v422_v5 = vadd.f32 %v1404_v26, %v1398_v24 }
 0x164   : > { %v390_v34 = vrot.slane %v389_v0, 4  ;;  %v397_v35 = vrot.slane %v396_v1, 4  ;;  %v416_v36 = vrot.slane %v415_v4, 4  ;;  %v423_v37 = vrot.slane %v422_v5, 4 }
 0x166   : > { %v391_v42 = vmax.f32 %v389_v0, %v390_v34  ;;  %v398_v43 = vmax.f32 %v396_v1, %v397_v35  ;;  %v417_v44 = vadd.f32 %v416_v36, %v415_v4  ;;  %v424_v45 = vadd.f32 %v423_v37, %v422_v5 }
 0x168   : > { %v392_v46 = vrot.slane %v391_v42, 2  ;;  %v399_v47 = vrot.slane %v398_v43, 2  ;;  %v418_v48 = vrot.slane %v417_v44, 2  ;;  %v425_v49 = vrot.slane %v424_v45, 2 }
 0x16a   : > { %v393_v50 = vmax.f32 %v391_v42, %v392_v46  ;;  %v400_v51 = vmax.f32 %v398_v43, %v399_v47  ;;  %v419_v52 = vadd.f32 %v418_v48, %v417_v44  ;;  %v426_v53 = vadd.f32 %v425_v49, %v424_v45 }
 0x16c   : > { %v394_v55 = vrot.slane %v393_v50, 1  ;;  %v401_v56 = vrot.slane %v400_v51, 1  ;;  %v420_v57 = vrot.slane %v419_v52, 1  ;;  %v427_v58 = vrot.slane %v426_v53, 1 }
 0x16e   : > { %v402_v59 = vmax.f32 %v400_v51, %v401_v56  ;;  %v421_v60 = vadd.f32 %v420_v57, %v419_v52  ;;  %v428_v61 = vadd.f32 %v427_v58, %v426_v53  ;;  %v395_v62 = vmax.f32 %v393_v50, %v394_v55 }
 0x170   : > { %v405_v63 = vrot.slane %v402_v59, 7  ;;  %v430_v2 = vmul.f32 0.0625, %v428_v61  ;;  %v429_v6 = vmul.f32 0.0625, %v421_v60 }
 0x172   : > { %v407_v3 = vsel %vm406_vm9, %v395_v62, %v405_v63  ;;  %v433_v7 = vrot.slane %v430_v2, 7 }
 0x173   : > { %413 = vst.msk [vmem:[#allocation2] ss:$8 sm:$0x3] %vm411_vm10, %v407_v3 }
 0x174   : > { %v434_v8 = vsel %vm406_vm9, %v429_v6, %v433_v7 }
 0x175   : > { %436 = vst.msk [vmem:[#allocation3] ss:$8 sm:$0x3] %vm411_vm10, %v434_v8 }
 0x17a   : > { %v438_v11 = vld [vmem:[#allocation2] sm:$0xff]  ;;  %v439_v12 = vld [vmem:[#allocation2 + $0x8] sm:$0xff] }
 0x17c   : > { %v504_v9 = vld [vmem:[#allocation3] sm:$0xff]  ;;  %v505_v10 = vld [vmem:[#allocation3 + $0x8] sm:$0xff] }
 0x17d   : > { %586 = vmatmul.f32.vlgmr.msra.gmra.mxu0 %v504_v9  ;;  %606 = vmatmul.f32.vlgmr.msra.gmra.mxu1 %v505_v10 }
 0x17e   : > { %626 = vmatmul.f32.vlgmr.msra.gmra.mxu2 %v504_v9  ;;  %646 = vmatmul.f32.vlgmr.msra.gmra.mxu3 %v505_v10 }
 0x185   : > { %666 = vmatmul.f32.vlgmr.msrb.gmra.mxu0 %v438_v11  ;;  %686 = vmatmul.f32.vlgmr.msrb.gmra.mxu1 %v439_v12 }
 0x186   : > { %706 = vmatmul.f32.vlgmr.msrb.gmra.mxu2 %v438_v11  ;;  %726 = vmatmul.f32.vlgmr.msrb.gmra.mxu3 %v439_v12 }
 0x1fa   : > { %v587_v13 = vpop.f32.mrf.mxu0  ;;  %v607_v14 = vpop.f32.mrf.mxu1 }
 0x1fb   : > { %v608_v15 = vadd.f32 %v607_v14, %v587_v13 }
 0x201   : > { %v627_v16 = vpop.f32.mrf.mxu2  ;;  %v647_v17 = vpop.f32.mrf.mxu3 }
 0x202   : > { %v667_v18 = vpop.f32.mrf.mxu0  ;;  %v687_v20 = vpop.f32.mrf.mxu1  ;;  %v648_v27 = vadd.f32 %v647_v17, %v627_v16 }
 0x203   : > { %v668_v19 = vadd.f32 %v667_v18, %v608_v15 }
 0x205   : > { %v688_v21 = vadd.f32 %v687_v20, %v668_v19 }
 0x207   : > { %v730_v22 = vsub.f32 0.0, %v688_v21 }
 0x209   : > { %v732_v28 = vmul.f32 1.442695, %v730_v22  ;;  %v707_v29 = vpop.f32.mrf.mxu2  ;;  %v727_v0 = vpop.f32.mrf.mxu3 }
 0x20a   : > { %v708_v30 = vadd.f32 %v707_v29, %v648_v27 }
 0x20b   : > { %994 = vpow2.f32 %v732_v28 }
 0x20c   : > { %v728_v1 = vadd.f32 %v727_v0, %v708_v30 }
 0x20e   : > { %v731_v4 = vsub.f32 0.0, %v728_v1 }
 0x210   : > { %v734_v5 = vmul.f32 1.442695, %v731_v4 }
 0x211   : > { %v995_v31 = vpop.eup %994 }
 0x212   : > { %v736_v32 = vadd.f32 1.0, %v995_v31  ;;  %996 = vpow2.f32 %v734_v5 }
 0x214   : > { %998 = vrcp.f32 %v736_v32  ;;  %v749_v38 = vand.u32 2147483648, %v736_v32  ;;  %v747_v40 = vand.u32 2147483647, %v736_v32  ;;  %vm743_vm12 = vweird.f32 %v736_v32 }
 0x216   : > { %v750_v43 = vor.u32 1.1754944e-38, %v749_v38  ;;  %vm748_vm14 = vcmp.eq.f32.partialorder %v747_v40, 8.507059e+37 }
 0x218   : > { %v997_v33 = vpop.eup %996 }
 0x219   : > { %v737_v34 = vadd.f32 1.0, %v997_v33 }
 0x21a   : > { %v999_v35 = vpop.eup %998 }
 0x21b   : > { %v739_v36 = vmul.f32 %v999_v35, %v736_v32  ;;  %1000 = vrcp.f32 %v737_v34  ;;  %vm744_vm11 = vweird.f32 %v999_v35  ;;  %v764_v49 = vand.u32 2147483648, %v737_v34 }
 0x21c   : > { %vm745_vm13 = vmor %vm743_vm12, %vm744_vm11  ;;  %v762_v51 = vand.u32 2147483647, %v737_v34  ;;  %vm758_vm0 = vweird.f32 %v737_v34 }
 0x21d   : > { %v740_v37 = vsub.f32 1.0, %v739_v36  ;;  %v765_v55 = vor.u32 1.1754944e-38, %v764_v49 }
 0x21e   : > { %vm763_vm2 = vcmp.eq.f32.partialorder %v762_v51, 8.507059e+37 }
 0x21f   : > { %v741_v39 = vmul.f32 %v999_v35, %v740_v37 }
 0x221   : > { %v1001_v41 = vpop.eup %1000  ;;  %v742_v42 = vadd.f32 %v999_v35, %v741_v39 }
 0x222   : > { %v754_v44 = vmul.f32 %v1001_v41, %v737_v34  ;;  %vm759_vm15 = vweird.f32 %v1001_v41 }
 0x223   : > { %v746_v45 = vsel %vm745_vm13, %v999_v35, %v742_v42  ;;  %vm760_vm1 = vmor %vm758_vm0, %vm759_vm15 }
 0x224   : > { %v751_v46 = vsel %vm748_vm14, %v750_v43, %v746_v45  ;;  %v755_v47 = vsub.f32 1.0, %v754_v44 }
 0x225   : > { %v776_v48 = vperm.slane %v751_v46, 0 }
 0x226   : > { %v756_v50 = vmul.f32 %v1001_v41, %v755_v47 }
 0x227   : > { %v778_v52 = vmul.f32 %v776_v48, %v1395_v23  ;;  %v780_v53 = vmul.f32 %v776_v48, %v1401_v25 }
 0x228   : > { %v757_v54 = vadd.f32 %v1001_v41, %v756_v50 }
 0x229   : > { %782 = vst [vmem:[%s277_s16] sm:$0xff] %v778_v52 }
 0x22a   : > { %v761_v56 = vsel %vm760_vm1, %v1001_v41, %v757_v54  ;;  %784 = vst [vmem:[%s277_s16 + $0x10] sm:$0xff] %v780_v53 }
 0x22b   : > { %v766_v57 = vsel %vm763_vm2, %v765_v55, %v761_v56 }
 0x22c   : > { %v777_v23 = vperm.slane %v766_v57, 0 }
 0x22e   : > { %v779_v25 = vmul.f32 %v777_v23, %v1398_v24  ;;  %v781_v58 = vmul.f32 %v777_v23, %v1404_v26 }
 0x230   : > { %783 = vst [vmem:[%s277_s16 + $0x8] sm:$0xff] %v779_v25 }
 0x231   : > { %785 = vst [vmem:[%s277_s16 + $0x18] sm:$0xff] %v781_v58 }
 0x232   : > { %1119 = shalt.err (!%p1116_p10)
}
 0x233   : > { %s1169_s8 = smov 256   ;;  %s1170_s27 = smov 16  }
 0x234   : > { %924 = dma.vmem_to_hbm [thread:$0]  (%p1273_p3), %s800_s22, 512, %s802_s28, %s787_s24, %s1169_s8, %s1169_s8, %s1170_s27  }
 0x235 PF: > { %s816_s30 = sand.u32 1, %s1150_s18   ;;  %p1468_p12 = scmp.ge.s32.totalorder %s1162_s21, 2 }
 0x236   : > { %s817_s6 = scalar_lea.sflag [#allocation6], %s816_s30 }
 0x237   : > { %p938_p13 = pnand %p1468_p12, %p1236_p6 }
 0x239   : > { %p939_p0 = pneg %p938_p13 }
 0x23b   : > { %1145 = dma.done.wait (%p939_p0), %s817_s6, 512  }
 0x23c   : > { %1147 = vsyncadd (%p939_p0), %s817_s6, 4294966784  ;;  %p19_p5 = scmp.ge.s32.totalorder %s1263_s14, 4   ;;  %s1469_s18 = smov %s1154_s19 }
 0x23d   : > { %s1470_s19 = smov %s1158_s20  ;;  %s1471_s20 = smov %s1279_s23 }
 0x23e   : > { %s1472_s21 = smov %s1263_s14  ;;  %21 = sbr.rel (!%p19_p5) target bundleno = 6 (0x6), region = 93 }
 0x243   :  { %823 = vsyncpa [#allocation5], 1 }
 0x244   :  { %825 = vsyncpa [#allocation5 + $0x1], 1 }
 0x245   :  { %826 = vsyncpa [#allocation8], 1 }
 0x246   :  { %827 = vsyncpa [#allocation6], 1 }
 0x247   :  { %829 = vsyncpa [#allocation6 + $0x1], 1 }

</bundles_post_ra>
